<compile_context>
chip_gen: v7x
topology: tpu7x:2x2x1
jax: 0.10.0
libtpu: 0.0.40
codegen_flags: <defaults>
</compile_context>

<pallas_src>
import functools
import math

import jax
import jax.numpy as jnp
from jax import lax
from jax.experimental import pallas as pl
from jax.experimental.pallas import tpu as pltpu


def _round_up(x, m):
    return ((x + m - 1) // m) * m


def _router_kernel(x_ref, noise_ref, wl_ref, bl_ref, wn_ref, bn_ref,
                   probs_ref, idx_ref, *, use_bf16_mxu):
    # x_ref:     [tm, D]      noise_ref: [tm, E]
    # wl_ref:    [D, E]       bl_ref:    [1, E]
    # wn_ref:    [D, E]       bn_ref:    [1, E]
    # probs_ref: [tm, E]      idx_ref:   [tm, K]
    tm, num_experts = probs_ref.shape
    top_k = idx_ref.shape[-1]

    x = x_ref[...]
    wl = wl_ref[...]
    wn = wn_ref[...]
    if use_bf16_mxu:
        x = x.astype(jnp.bfloat16)
        wl = wl.astype(jnp.bfloat16)
        wn = wn.astype(jnp.bfloat16)

    # Router logits and noise-scale logits (MXU, f32 accumulation; bias fused in f32).
    logits = (jnp.dot(x, wl, preferred_element_type=jnp.float32)
              + bl_ref[...].astype(jnp.float32))
    z = (jnp.dot(x, wn, preferred_element_type=jnp.float32)
         + bn_ref[...].astype(jnp.float32))

    # Numerically stable softplus (exp/log run on the EUP); noisy logits.
    softplus = jnp.maximum(z, 0.0) + jnp.log(1.0 + jnp.exp(-jnp.abs(z)))
    noisy = logits + noise_ref[...].astype(jnp.float32) * softplus

    e_iota = lax.broadcasted_iota(jnp.int32, (tm, num_experts), 1)
    e_iota_f = e_iota.astype(jnp.float32)

    # Unrolled top-k (top_k is a small static int): successively peel off maxima.
    # Index of the first occurrence of each maximum matches torch.topk tie behavior.
    top_vals = []
    top_idxs = []
    remaining = noisy
    for _ in range(top_k):
        m = jnp.max(remaining, axis=-1, keepdims=True)
        idx = jnp.min(jnp.where(remaining == m, e_iota_f, float(num_experts)),
                      axis=-1, keepdims=True).astype(jnp.int32)
        top_vals.append(m)
        top_idxs.append(idx)
        remaining = jnp.where(e_iota == idx, -jnp.inf, remaining)

    # Softmax over only the selected logits (every other expert is -inf -> prob 0).
    m_max = top_vals[0]
    exps = [jnp.exp(v - m_max) for v in top_vals]
    denom = exps[0]
    for e in exps[1:]:
        denom = denom + e
    inv_denom = 1.0 / denom

    probs = jnp.zeros((tm, num_experts), jnp.float32)
    for idx, e in zip(top_idxs, exps):
        probs = jnp.where(e_iota == idx, e * inv_denom, probs)
    probs_ref[...] = probs.astype(probs_ref.dtype)

    # Indices in descending-logit order (same convention as torch.topk).
    k_iota = lax.broadcasted_iota(jnp.int32, (tm, top_k), 1)
    idx_out = jnp.zeros((tm, top_k), jnp.int32)
    for k, idx in enumerate(top_idxs):
        idx_out = jnp.where(k_iota == k, idx, idx_out)
    idx_ref[...] = idx_out


def noisy_topk_router_forward(x, w_linear, b_linear, w_noise, b_noise, noise,
                              *, top_k=2, row_tile=None, use_bf16_mxu=False,
                              vmem_limit_bytes=48 * 1024 * 1024):
    """Pallas forward of NoisyTopkRouter.

    x: [..., dim]; w_*: [dim, E]; b_*: [E]; noise: [..., E] standard-normal draws.
    Returns (probs [..., E], indices [..., top_k] int32, lb_loss scalar).
    """
    *lead, dim = x.shape
    num_experts = w_linear.shape[1]
    x2d = x.reshape(-1, dim)
    noise2d = noise.reshape(-1, num_experts)
    n_rows = x2d.shape[0]

    # Row tile: big enough for DMA/compute overlap and megacore row-sharding on v7x,
    # multiple of 8 for sublane alignment; remainder handled by padding (no divisibility
    # assert on arbitrary batch*seq).
    if row_tile is None:
        row_tile = 256
    tm = min(row_tile, _round_up(n_rows, 8))
    tm = _round_up(tm, 8)
    n_pad = _round_up(n_rows, tm)
    if n_pad != n_rows:
        x2d = jnp.pad(x2d, ((0, n_pad - n_rows), (0, 0)))
        noise2d = jnp.pad(noise2d, ((0, n_pad - n_rows), (0, 0)))

    bl2 = b_linear.reshape(1, num_experts)
    bn2 = b_noise.reshape(1, num_experts)

    kernel = functools.partial(_router_kernel, use_bf16_mxu=use_bf16_mxu)
    # Grid-invariant operands: whole array resident in VMEM, no double buffering.
    vmem_full = pl.BlockSpec(memory_space=pltpu.MemorySpace.VMEM)

    probs, idx = pl.pallas_call(
        kernel,
        out_shape=(jax.ShapeDtypeStruct((n_pad, num_experts), jnp.float32),
                   jax.ShapeDtypeStruct((n_pad, top_k), jnp.int32)),
        grid_spec=pltpu.PrefetchScalarGridSpec(
            num_scalar_prefetch=0,
            grid=(n_pad // tm,),
            in_specs=[
                pl.BlockSpec((tm, dim), lambda i: (i, 0)),           # x rows (pipelined)
                pl.BlockSpec((tm, num_experts), lambda i: (i, 0)),   # gaussian noise rows
                vmem_full,                                           # w_linear
                vmem_full,                                           # b_linear
                vmem_full,                                           # w_noise
                vmem_full,                                           # b_noise
            ],
            out_specs=[
                pl.BlockSpec((tm, num_experts), lambda i: (i, 0)),
                pl.BlockSpec((tm, top_k), lambda i: (i, 0)),
            ],
        ),
        compiler_params=pltpu.CompilerParams(
            dimension_semantics=("parallel",),
            vmem_limit_bytes=vmem_limit_bytes),
    )(x2d, noise2d, w_linear, bl2, w_noise, bn2)

    probs = probs[:n_rows].reshape(*lead, num_experts)
    idx = idx[:n_rows].reshape(*lead, top_k)

    # Load-balancing loss: tiny O(N*E) reduction over all leading axes, in plain JAX.
    probs_flat = probs.reshape(-1, num_experts)
    prob_mean = probs_flat.mean(axis=0)
    expert_mask = jax.nn.one_hot(idx, num_experts, dtype=probs.dtype).sum(axis=-2)
    prob_count = expert_mask.reshape(-1, num_experts).mean(axis=0)
    lb_loss = num_experts * jnp.sum(prob_mean * prob_count)
    return probs, idx, lb_loss


if __name__ == "__main__":
    num_experts = 8
    top_k = 2
    batch, seq, dim = 2, 8, 32

    key = jax.random.PRNGKey(0)
    k_x, k_wl, k_bl, k_wn, k_bn, k_noise = jax.random.split(key, 6)

    bound = 1.0 / math.sqrt(dim)
    x = jax.random.normal(k_x, (batch, seq, dim), jnp.float32)
    # nn.Linear-style init, stored as [in, out] so the kernel does x @ W.
    w_linear = jax.random.uniform(k_wl, (dim, num_experts), jnp.float32, -bound, bound)
    b_linear = jax.random.uniform(k_bl, (num_experts,), jnp.float32, -bound, bound)
    w_noise = jax.random.uniform(k_wn, (dim, num_experts), jnp.float32, -bound, bound)
    b_noise = jax.random.uniform(k_bn, (num_experts,), jnp.float32, -bound, bound)
    # Standard-normal draws equivalent to torch.randn_like(logits), generated outside the
    # kernel so the Pallas path and the reference see identical randomness.
    noise = jax.random.normal(k_noise, (batch, seq, num_experts), jnp.float32)

    probs, indices, lb_loss = noisy_topk_router_forward(
        x, w_linear, b_linear, w_noise, b_noise, noise, top_k=top_k)
    probs, indices, lb_loss = jax.block_until_ready((probs, indices, lb_loss))

    # ---- pure-JAX reference (same math as the PyTorch module) ----
    logits_ref = x @ w_linear + b_linear
    scale_ref = jax.nn.softplus(x @ w_noise + b_noise)
    noisy_ref = logits_ref + noise * scale_ref
    top_vals_ref, top_idx_ref = jax.lax.top_k(noisy_ref, top_k)
    sel = jax.nn.one_hot(top_idx_ref, num_experts).sum(axis=-2) > 0
    masked_ref = jnp.where(sel, noisy_ref, -jnp.inf)
    probs_ref = jax.nn.softmax(masked_ref, axis=-1)
    prob_mean_ref = probs_ref.mean(axis=(0, 1))
    expert_mask_ref = jax.nn.one_hot(top_idx_ref, num_experts, dtype=jnp.float32).sum(axis=-2)
    prob_count_ref = expert_mask_ref.mean(axis=(0, 1))
    lb_loss_ref = num_experts * jnp.sum(prob_mean_ref * prob_count_ref)

    assert probs.shape == (batch, seq, num_experts)
    assert indices.shape == (batch, seq, top_k)
    assert jnp.array_equal(indices, top_idx_ref), "top-k indices mismatch"
    assert jnp.allclose(probs, probs_ref, atol=1e-5, rtol=1e-5), "probs mismatch"
    assert jnp.allclose(lb_loss, lb_loss_ref, atol=1e-5, rtol=1e-5), "lb_loss mismatch"

    print("KERNEL_OK")
</pallas_src>

<mosaic_0001>
module attributes {stable_mosaic.version = 11 : i64} {
  func.func @_router_kernel(%arg0: i32, %arg1: memref<16x32xf32, #tpu.memory_space<vmem>>, %arg2: memref<16x8xf32, #tpu.memory_space<vmem>>, %arg3: memref<32x8xf32, #tpu.memory_space<vmem>>, %arg4: memref<1x8xf32, #tpu.memory_space<vmem>>, %arg5: memref<32x8xf32, #tpu.memory_space<vmem>>, %arg6: memref<1x8xf32, #tpu.memory_space<vmem>>, %arg7: memref<16x8xf32, #tpu.memory_space<vmem>>, %arg8: memref<16x2xi32, #tpu.memory_space<vmem>>) attributes {dimension_semantics = [#tpu.dimension_semantics<parallel>], iteration_bounds = array<i64: 1>, scalar_prefetch = 0 : i64, scratch_operands = 0 : i64, tpu.core_type = #tpu.core_type<tc>, window_params = [{transform_indices = @transform_0, window_bounds = array<i64: 16, 32>}, {transform_indices = @transform_1, window_bounds = array<i64: 16, 8>}, {pipeline_mode = #tpu.pipeline_mode<synchronous>, transform_indices = @transform_2, window_bounds = array<i64: 32, 8>}, {pipeline_mode = #tpu.pipeline_mode<synchronous>, transform_indices = @transform_3, window_bounds = array<i64: 1, 8>}, {pipeline_mode = #tpu.pipeline_mode<synchronous>, transform_indices = @transform_4, window_bounds = array<i64: 32, 8>}, {pipeline_mode = #tpu.pipeline_mode<synchronous>, transform_indices = @transform_5, window_bounds = array<i64: 1, 8>}, {transform_indices = @transform_6, window_bounds = array<i64: 16, 8>}, {transform_indices = @transform_7, window_bounds = array<i64: 16, 2>}]} {
    %c0 = arith.constant 0 : index
    %c0_0 = arith.constant 0 : index
    %0 = vector.load %arg1[%c0, %c0_0] : memref<16x32xf32, #tpu.memory_space<vmem>>, vector<16x32xf32>
    %c0_1 = arith.constant 0 : index
    %c0_2 = arith.constant 0 : index
    %1 = vector.load %arg3[%c0_1, %c0_2] : memref<32x8xf32, #tpu.memory_space<vmem>>, vector<32x8xf32>
    %c0_3 = arith.constant 0 : index
    %c0_4 = arith.constant 0 : index
    %2 = vector.load %arg5[%c0_3, %c0_4] : memref<32x8xf32, #tpu.memory_space<vmem>>, vector<32x8xf32>
    %cst = arith.constant dense<0.000000e+00> : vector<16x8xf32>
    %3 = tpu.matmul %0, %1, %cst {dimension_numbers = #tpu.dot_dimension_numbers<[1], [0], [0], [1], [0, 0, 1, 1], [], []>} : vector<16x32xf32>, vector<32x8xf32>, vector<16x8xf32> -> vector<16x8xf32>
    %c0_5 = arith.constant 0 : index
    %c0_6 = arith.constant 0 : index
    %4 = vector.load %arg4[%c0_5, %c0_6] : memref<1x8xf32, #tpu.memory_space<vmem>>, vector<1x8xf32>
    %5 = vector.broadcast %4 : vector<1x8xf32> to vector<16x8xf32>
    %6 = arith.addf %3, %5 : vector<16x8xf32>
    %cst_7 = arith.constant dense<0.000000e+00> : vector<16x8xf32>
    %7 = tpu.matmul %0, %2, %cst_7 {dimension_numbers = #tpu.dot_dimension_numbers<[1], [0], [0], [1], [0, 0, 1, 1], [], []>} : vector<16x32xf32>, vector<32x8xf32>, vector<16x8xf32> -> vector<16x8xf32>
    %c0_8 = arith.constant 0 : index
    %c0_9 = arith.constant 0 : index
    %8 = vector.load %arg6[%c0_8, %c0_9] : memref<1x8xf32, #tpu.memory_space<vmem>>, vector<1x8xf32>
    %9 = vector.broadcast %8 : vector<1x8xf32> to vector<16x8xf32>
    %10 = arith.addf %7, %9 : vector<16x8xf32>
    %cst_10 = arith.constant 0.000000e+00 : f32
    %11 = vector.broadcast %cst_10 : f32 to vector<16x8xf32>
    %12 = arith.maximumf %10, %11 : vector<16x8xf32>
    %13 = math.absf %10 : vector<16x8xf32>
    %cst_11 = arith.constant 0.000000e+00 : f32
    %14 = vector.broadcast %cst_11 : f32 to vector<16x8xf32>
    %15 = arith.subf %14, %13 : vector<16x8xf32>
    %16 = math.exp %15 : vector<16x8xf32>
    %cst_12 = arith.constant 1.000000e+00 : f32
    %17 = vector.broadcast %cst_12 : f32 to vector<16x8xf32>
    %18 = arith.addf %17, %16 : vector<16x8xf32>
    %19 = math.log %18 : vector<16x8xf32>
    %20 = arith.addf %12, %19 : vector<16x8xf32>
    %c0_13 = arith.constant 0 : index
    %c0_14 = arith.constant 0 : index
    %21 = vector.load %arg2[%c0_13, %c0_14] : memref<16x8xf32, #tpu.memory_space<vmem>>, vector<16x8xf32>
    %22 = arith.mulf %21, %20 : vector<16x8xf32>
    %23 = arith.addf %6, %22 : vector<16x8xf32>
    %24 = tpu.iota {dimensions = array<i32: 1>} : vector<16x8xi32>
    %25 = arith.sitofp %24 : vector<16x8xi32> to vector<16x8xf32>
    %cst_15 = arith.constant dense<0xFF800000> : vector<16xf32>
    %26 = vector.multi_reduction <maximumf>, %23, %cst_15 [1] : vector<16x8xf32> to vector<16xf32>
    %27 = vector.shape_cast %26 : vector<16xf32> to vector<16x1xf32>
    %28 = vector.broadcast %27 : vector<16x1xf32> to vector<16x8xf32>
    %29 = arith.cmpf oeq, %23, %28 : vector<16x8xf32>
    %cst_16 = arith.constant 8.000000e+00 : f32
    %30 = vector.broadcast %cst_16 : f32 to vector<16x8xf32>
    %31 = arith.select %29, %25, %30 : vector<16x8xi1>, vector<16x8xf32>
    %cst_17 = arith.constant dense<0x7F800000> : vector<16xf32>
    %32 = vector.multi_reduction <minimumf>, %31, %cst_17 [1] : vector<16x8xf32> to vector<16xf32>
    %33 = vector.shape_cast %32 : vector<16xf32> to vector<16x1xf32>
    %34 = arith.fptosi %33 : vector<16x1xf32> to vector<16x1xi32>
    %35 = vector.broadcast %34 : vector<16x1xi32> to vector<16x8xi32>
    %36 = arith.cmpi eq, %24, %35 : vector<16x8xi32>
    %cst_18 = arith.constant 0xFF800000 : f32
    %37 = vector.broadcast %cst_18 : f32 to vector<16x8xf32>
    %38 = arith.select %36, %37, %23 : vector<16x8xi1>, vector<16x8xf32>
    %cst_19 = arith.constant dense<0xFF800000> : vector<16xf32>
    %39 = vector.multi_reduction <maximumf>, %38, %cst_19 [1] : vector<16x8xf32> to vector<16xf32>
    %40 = vector.shape_cast %39 : vector<16xf32> to vector<16x1xf32>
    %41 = vector.broadcast %40 : vector<16x1xf32> to vector<16x8xf32>
    %42 = arith.cmpf oeq, %38, %41 : vector<16x8xf32>
    %cst_20 = arith.constant 8.000000e+00 : f32
    %43 = vector.broadcast %cst_20 : f32 to vector<16x8xf32>
    %44 = arith.select %42, %25, %43 : vector<16x8xi1>, vector<16x8xf32>
    %cst_21 = arith.constant dense<0x7F800000> : vector<16xf32>
    %45 = vector.multi_reduction <minimumf>, %44, %cst_21 [1] : vector<16x8xf32> to vector<16xf32>
    %46 = vector.shape_cast %45 : vector<16xf32> to vector<16x1xf32>
    %47 = arith.fptosi %46 : vector<16x1xf32> to vector<16x1xi32>
    %48 = arith.subf %27, %27 : vector<16x1xf32>
    %49 = math.exp %48 : vector<16x1xf32>
    %50 = arith.subf %40, %27 : vector<16x1xf32>
    %51 = math.exp %50 : vector<16x1xf32>
    %52 = arith.addf %49, %51 : vector<16x1xf32>
    %cst_22 = arith.constant 1.000000e+00 : f32
    %53 = vector.broadcast %cst_22 : f32 to vector<16x1xf32>
    %54 = arith.divf %53, %52 : vector<16x1xf32>
    %cst_23 = arith.constant 0.000000e+00 : f32
    %55 = vector.broadcast %cst_23 : f32 to vector<16x8xf32>
    %56 = vector.broadcast %34 : vector<16x1xi32> to vector<16x8xi32>
    %57 = arith.cmpi eq, %24, %56 : vector<16x8xi32>
    %58 = arith.mulf %49, %54 : vector<16x1xf32>
    %59 = vector.shape_cast %58 : vector<16x1xf32> to vector<16x1xf32>
    %60 = vector.broadcast %59 : vector<16x1xf32> to vector<16x8xf32>
    %61 = arith.select %57, %60, %55 : vector<16x8xi1>, vector<16x8xf32>
    %62 = vector.broadcast %47 : vector<16x1xi32> to vector<16x8xi32>
    %63 = arith.cmpi eq, %24, %62 : vector<16x8xi32>
    %64 = arith.mulf %51, %54 : vector<16x1xf32>
    %65 = vector.shape_cast %64 : vector<16x1xf32> to vector<16x1xf32>
    %66 = vector.broadcast %65 : vector<16x1xf32> to vector<16x8xf32>
    %67 = arith.select %63, %66, %61 : vector<16x8xi1>, vector<16x8xf32>
    %c0_24 = arith.constant 0 : index
    %c0_25 = arith.constant 0 : index
    %68 = vector.load %arg7[%c0_24, %c0_25] : memref<16x8xf32, #tpu.memory_space<vmem>>, vector<16x8xf32>
    tpu.vector_store %arg7[%c0_24, %c0_25], %67 {strides = array<i32>} : memref<16x8xf32, #tpu.memory_space<vmem>>, vector<16x8xf32>,
    %69 = tpu.iota {dimensions = array<i32: 1>} : vector<16x2xi32>
    %c0_i32 = arith.constant 0 : i32
    %70 = vector.broadcast %c0_i32 : i32 to vector<16x2xi32>
    %c0_i32_26 = arith.constant 0 : i32
    %71 = vector.broadcast %c0_i32_26 : i32 to vector<16x2xi32>
    %72 = arith.cmpi eq, %69, %71 : vector<16x2xi32>
    %73 = vector.shape_cast %34 : vector<16x1xi32> to vector<16x1xi32>
    %74 = vector.broadcast %73 : vector<16x1xi32> to vector<16x2xi32>
    %75 = arith.select %72, %74, %70 : vector<16x2xi1>, vector<16x2xi32>
    %c1_i32 = arith.constant 1 : i32
    %76 = vector.broadcast %c1_i32 : i32 to vector<16x2xi32>
    %77 = arith.cmpi eq, %69, %76 : vector<16x2xi32>
    %78 = vector.shape_cast %47 : vector<16x1xi32> to vector<16x1xi32>
    %79 = vector.broadcast %78 : vector<16x1xi32> to vector<16x2xi32>
    %80 = arith.select %77, %79, %75 : vector<16x2xi1>, vector<16x2xi32>
    %c0_27 = arith.constant 0 : index
    %c0_28 = arith.constant 0 : index
    %81 = vector.load %arg8[%c0_27, %c0_28] : memref<16x2xi32, #tpu.memory_space<vmem>>, vector<16x2xi32>
    tpu.vector_store %arg8[%c0_27, %c0_28], %80 {strides = array<i32>} : memref<16x2xi32, #tpu.memory_space<vmem>>, vector<16x2xi32>,
    return
  }
  func.func @transform_0(%arg0: i32) -> (i32, i32) {
    %c0_i32 = arith.constant 0 : i32
    %c0_i32_0 = arith.constant 0 : i32
    return %arg0, %c0_i32 : i32, i32
  }
  func.func @transform_1(%arg0: i32) -> (i32, i32) {
    %c0_i32 = arith.constant 0 : i32
    %c0_i32_0 = arith.constant 0 : i32
    return %arg0, %c0_i32 : i32, i32
  }
  func.func @transform_2(%arg0: i32) -> (i32, i32) {
    %c0_i32 = arith.constant 0 : i32
    %c0_i32_0 = arith.constant 0 : i32
    %c0_i32_1 = arith.constant 0 : i32
    return %c0_i32, %c0_i32_0 : i32, i32
  }
  func.func @transform_3(%arg0: i32) -> (i32, i32) {
    %c0_i32 = arith.constant 0 : i32
    %c0_i32_0 = arith.constant 0 : i32
    %c0_i32_1 = arith.constant 0 : i32
    return %c0_i32, %c0_i32_0 : i32, i32
  }
  func.func @transform_4(%arg0: i32) -> (i32, i32) {
    %c0_i32 = arith.constant 0 : i32
    %c0_i32_0 = arith.constant 0 : i32
    %c0_i32_1 = arith.constant 0 : i32
    return %c0_i32, %c0_i32_0 : i32, i32
  }
  func.func @transform_5(%arg0: i32) -> (i32, i32) {
    %c0_i32 = arith.constant 0 : i32
    %c0_i32_0 = arith.constant 0 : i32
    %c0_i32_1 = arith.constant 0 : i32
    return %c0_i32, %c0_i32_0 : i32, i32
  }
  func.func @transform_6(%arg0: i32) -> (i32, i32) {
    %c0_i32 = arith.constant 0 : i32
    %c0_i32_0 = arith.constant 0 : i32
    return %arg0, %c0_i32 : i32, i32
  }
  func.func @transform_7(%arg0: i32) -> (i32, i32) {
    %c0_i32 = arith.constant 0 : i32
    %c0_i32_0 = arith.constant 0 : i32
    return %arg0, %c0_i32 : i32, i32
  }
}

</mosaic_0001>

<bundles_post_ra>
// kernel: tpu_custom_call.1
= control target key start
LH: loop header
LB: loop body
LE: loop exit
PB: predicated region body
PF: predicated region fallthrough
CT: control target
= control target key end

     0   :  { %vm42_vm0 = vcmask 261120   ;;  %vm233_vm1 = vcmask 64512   ;;  %v230_v50 = vlaneseq  ;;  %vm310_vm10 = vcmask 15360   ;;  %s546_s4 = inlined_call_operand.vmem [shape: f32[32,8], index: 4, kind: input, shape index: {}]   ;;  %s547_s0 = inlined_call_operand.vmem [shape: f32[16,32], index: 0, kind: input, shape index: {}]   ;;  %s548_s2 = inlined_call_operand.vmem [shape: f32[32,8], index: 2, kind: input, shape index: {}]   ;;  %s549_s5 = inlined_call_operand.vmem [shape: f32[1,8], index: 5, kind: input, shape index: {}]   ;;  %s550_s3 = inlined_call_operand.vmem [shape: f32[1,8], index: 3, kind: input, shape index: {}]   ;;  %s551_s1 = inlined_call_operand.vmem [shape: f32[16,8], index: 1, kind: input, shape index: {}]   ;;  %s552_s7 = inlined_call_operand.vmem [shape: s32[16,2], index: 7, kind: output, shape index: {1}]   ;;  %s553_s6 = inlined_call_operand.vmem [shape: f32[16,8], index: 6, kind: output, shape index: {0}]  }
   0x1   :  { %v31_v0 = vld [vmem:[%s546_s4] sm:$0xff]  ;;  %v32_v1 = vld [vmem:[%s546_s4 + $0x8] sm:$0xff]  ;;  %v33_v2 = vld [vmem:[%s546_s4 + $0x10] sm:$0xff] }
   0x2   :  { %v369_v3 = vpack.c.bf16 %v32_v1, %v31_v0  ;;  %v34_v4 = vld [vmem:[%s546_s4 + $0x18] sm:$0xff]  ;;  %v25_v5 = vld [vmem:[%s547_s0] sm:$0xff]  ;;  %v28_v8 = vld [vmem:[%s548_s2 + $0x8] sm:$0xff]  ;;  %v493_v51 = vand.u32 127, %v230_v50 }
   0x3   :  { %v373_v6 = vpack.c.bf16 %v34_v4, %v33_v2  ;;  %358 = vmatprep.mubr.msk.f32.mxu1 %vm42_vm0, %v25_v5  ;;  %v27_v7 = vld [vmem:[%s548_s2] sm:$0xff]  ;;  %v29_v9 = vld [vmem:[%s548_s2 + $0x10] sm:$0xff]  ;;  %347 = vmatprep.mubr.msk.f32.mxu0 %vm42_vm0, %v25_v5  ;;  %v30_v11 = vld [vmem:[%s548_s2 + $0x18] sm:$0xff] }
   0x4   :  { %370 = vmatprep.subr.bf16.mxu1 %v369_v3  ;;  %v361_v10 = vpack.c.bf16 %v28_v8, %v27_v7  ;;  %v365_v12 = vpack.c.bf16 %v30_v11, %v29_v9  ;;  %v26_v13 = vld [vmem:[%s547_s0 + $0x8] sm:$0xff]  ;;  %v324_v14 = vld [vmem:[%s549_s5] ss:$0 sm:$0xff]  ;;  %v232_v52 = vcvt.s32.f32 %v493_v51  ;;  %vm304_vm8 = vcmp.eq.s32.totalorder %v493_v51, 0 }
   0x5   :  { %372 = vmatpush3.bf16.msra.mxu1 %v369_v3  ;;  %v321_v32 = vld [vmem:[%s550_s3] ss:$0 sm:$0xff]  ;;  %v225_v38 = vld [vmem:[%s551_s1 + $0x8] sm:$0xff]  ;;  %vm307_vm9 = vcmp.eq.s32.totalorder %v493_v51, 1 }
   0x6   :  { %374 = vmatprep.subr.bf16.mxu1 %v373_v6  ;;  %362 = vmatprep.subr.bf16.mxu0 %v361_v10  ;;  %v224_v41 = vld [vmem:[%s551_s1] sm:$0xff] }
   0x7   :  { %364 = vmatpush3.bf16.msra.mxu0 %v361_v10 }
   0x8   :  { %366 = vmatprep.subr.bf16.mxu0 %v365_v12 }
   0x9   :  { %376 = vmatpush3.bf16.msra.mxu1 %v373_v6 }
   0xb   :  { %368 = vmatpush3.bf16.msra.mxu0 %v365_v12 }
   0xc   :  { %359 = vmatmul.mubr.msk.f32.vlgmr.msra.gmra.mrb[0].mxu1 %vm42_vm0, %v26_v13 }
   0xe   :  { %348 = vmatmul.mubr.msk.f32.vlgmr.msra.gmra.mrb[0].mxu0 %vm42_vm0, %v26_v13 }
  0xdf   :  { %v360_v15 = vpop.f32.mrb[0].mxu1 }
  0xe0   :  { %v203_v16 = vadd.f32 %v360_v15, %v324_v14  ;;  %v197_v17 = vpop.f32.mrb[1].mxu1 }
  0xe1   :  { %v198_v18 = vadd.f32 %v324_v14, %v197_v17  ;;  %v349_v19 = vpop.f32.mrb[0].mxu0 }
  0xe2   :  { %v209_v20 = vand.u32 2147483647, %v203_v16  ;;  %v115_v21 = vpop.f32.mrb[1].mxu0  ;;  %v207_v34 = vmax.f32 %v203_v16, 0.0  ;;  %v121_v40 = vadd.f32 %v349_v19, %v321_v32 }
  0xe3   :  { %v208_v22 = vand.u32 2147483647, %v198_v18  ;;  %v206_v36 = vmax.f32 %v198_v18, 0.0  ;;  %v116_v43 = vadd.f32 %v321_v32, %v115_v21 }
  0xe4   :  { %v211_v23 = vsub.f32 0.0, %v209_v20 }
  0xe5   :  { %v210_v24 = vsub.f32 0.0, %v208_v22 }
  0xe6   :  { %v214_v25 = vmul.f32 1.442695, %v211_v23 }
  0xe7   :  { %v212_v26 = vmul.f32 1.442695, %v210_v24 }
  0xe8   :  { %385 = vpow2.f32 %v214_v25 }
  0xe9   :  { %387 = vpow2.f32 %v212_v26 }
  0xf2   :  { %v386_v27 = vpop.eup %385 }
  0xf3   :  { %v388_v28 = vpop.eup %387  ;;  %v217_v29 = vadd.f32 1.0, %v386_v27 }
  0xf4   :  { %v216_v30 = vadd.f32 1.0, %v388_v28 }
  0xf5   :  { %389 = vlog2.f32 %v217_v29 }
  0xf6   :  { %391 = vlog2.f32 %v216_v30 }
  0xff   :  { %v390_v31 = vpop.eup %389 }
 0x100   :  { %v392_v33 = vpop.eup %391  ;;  %v221_v35 = vmul.f32 0.6931472, %v390_v31 }
 0x101   :  { %v219_v37 = vmul.f32 0.6931472, %v392_v33 }
 0x102   :  { %v223_v39 = vadd.f32 %v221_v35, %v207_v34 }
 0x103   :  { %v222_v42 = vadd.f32 %v219_v37, %v206_v36 }
 0x104   :  { %v227_v44 = vmul.f32 %v225_v38, %v223_v39 }
 0x105   :  { %v226_v45 = vmul.f32 %v224_v41, %v222_v42 }
 0x106   :  { %v229_v46 = vadd.f32 %v227_v44, %v121_v40 }
 0x107   :  { %v228_v47 = vadd.f32 %v226_v45, %v116_v43 }
 0x108   :  { %v237_v49 = vsel %vm233_vm1, %v229_v46, -inf }
 0x109   :  { %v234_v48 = vsel %vm233_vm1, %v228_v47, -inf }
 0x10a   :  { %235 = vmax.xlane.f32.xlu0 %v234_v48 }
 0x10e   :  { %238 = vmax.xlane.f32.xlu0 %v237_v49 }
 0x197   :  { %v236_v53 = vpop.xlane.xlu0 %235 }
 0x198   :  { %vm240_vm2 = vcmp.eq.f32.partialorder %v228_v47, %v236_v53  ;;  %v274_v12 = vsub.f32 %v236_v53, %v236_v53 }
 0x199   :  { %v242_v54 = vsel %vm240_vm2, %v232_v52, 8.0 }
 0x19a   :  { %v244_v55 = vsel %vm233_vm1, %v242_v54, inf  ;;  %v276_v15 = vmul.f32 1.442695, %v274_v12 }
 0x19b   :  { %245 = vmin.xlane.f32.xlu1 %v244_v55  ;;  %v239_v56 = vpop.xlane.xlu0 %238 }
 0x19c   :  { %vm241_vm3 = vcmp.eq.f32.partialorder %v229_v46, %v239_v56  ;;  %v275_v16 = vsub.f32 %v239_v56, %v239_v56 }
 0x19d   :  { %v243_v57 = vsel %vm241_vm3, %v232_v52, 8.0 }
 0x19e   :  { %v247_v58 = vsel %vm233_vm1, %v243_v57, inf  ;;  %v278_v18 = vmul.f32 1.442695, %v275_v16 }
 0x19f   :  { %248 = vmin.xlane.f32.xlu1 %v247_v58 }
 0x228   :  { %v246_v59 = vpop.xlane.xlu1 %245 }
 0x229   :  { %v377_v60 = vtrunc.f32 %v246_v59 }
 0x22b   :  { %v378_v61 = vcvt.f32.s32 %v377_v60 }
 0x22c   :  { %v249_v62 = vpop.xlane.xlu1 %248 }
 0x22d   :  { %v379_v63 = vtrunc.f32 %v249_v62  ;;  %vm252_vm4 = vcmp.eq.s32.totalorder %v493_v51, %v378_v61  ;;  %v305_v31 = vsel %vm304_vm8, %v378_v61, 0 }
 0x22e   :  { %v254_v0 = vsel %vm252_vm4, -inf, %v228_v47 }
 0x22f   :  { %v501_v1 = vcvt.f32.s32 %v379_v63  ;;  %v256_v2 = vsel %vm233_vm1, %v254_v0, -inf }
 0x230   :  { %257 = vmax.xlane.f32.xlu0 %v256_v2 }
 0x231   :  { %vm253_vm5 = vcmp.eq.s32.totalorder %v493_v51, %v501_v1  ;;  %v306_v40 = vsel %vm304_vm8, %v501_v1, 0 }
 0x232   :  { %v255_v3 = vsel %vm253_vm5, -inf, %v229_v46 }
 0x233   :  { %v259_v4 = vsel %vm233_vm1, %v255_v3, -inf }
 0x234   :  { %260 = vmax.xlane.f32.xlu1 %v259_v4 }
 0x2bd   :  { %v258_v5 = vpop.xlane.xlu0 %257 }
 0x2be   :  { %vm262_vm6 = vcmp.eq.f32.partialorder %v254_v0, %v258_v5  ;;  %v280_v11 = vsub.f32 %v258_v5, %v236_v53 }
 0x2bf   :  { %v264_v6 = vsel %vm262_vm6, %v232_v52, 8.0 }
 0x2c0   :  { %v266_v7 = vsel %vm233_vm1, %v264_v6, inf  ;;  %v282_v13 = vmul.f32 1.442695, %v280_v11 }
 0x2c1   :  { %v261_v8 = vpop.xlane.xlu1 %260  ;;  %267 = vmin.xlane.f32.xlu0 %v266_v7 }
 0x2c2   :  { %vm263_vm7 = vcmp.eq.f32.partialorder %v255_v3, %v261_v8  ;;  %v281_v14 = vsub.f32 %v261_v8, %v239_v56  ;;  %393 = vpow2.f32 %v282_v13 }
 0x2c3   :  { %v265_v9 = vsel %vm263_vm7, %v232_v52, 8.0  ;;  %395 = vpow2.f32 %v276_v15 }
 0x2c4   :  { %v269_v10 = vsel %vm233_vm1, %v265_v9, inf  ;;  %v284_v17 = vmul.f32 1.442695, %v281_v14 }
 0x2c5   :  { %270 = vmin.xlane.f32.xlu1 %v269_v10 }
 0x2c6   :  { %397 = vpow2.f32 %v284_v17 }
 0x2c7   :  { %399 = vpow2.f32 %v278_v18 }
 0x2cc   :  { %v394_v19 = vpop.eup %393 }
 0x2cd   :  { %v396_v20 = vpop.eup %395 }
 0x2ce   :  { %v286_v21 = vadd.f32 %v396_v20, %v394_v19 }
 0x2d0   :  { %v398_v22 = vpop.eup %397  ;;  %401 = vrcp.f32 %v286_v21 }
 0x2d1   :  { %v400_v23 = vpop.eup %399 }
 0x2d2   :  { %v287_v24 = vadd.f32 %v400_v23, %v398_v22 }
 0x2d4   :  { %403 = vrcp.f32 %v287_v24 }
 0x2da   :  { %v402_v25 = vpop.eup %401 }
 0x2db   :  { %v292_v26 = vmul.f32 %v402_v25, %v396_v20  ;;  %v298_v33 = vmul.f32 %v402_v25, %v394_v19 }
 0x2dd   :  { %v294_v32 = vsel %vm252_vm4, %v292_v26, 0.0 }
 0x2de   :  { %v404_v29 = vpop.eup %403 }
 0x2df   :  { %v293_v36 = vmul.f32 %v404_v29, %v400_v23  ;;  %v299_v41 = vmul.f32 %v404_v29, %v398_v22 }
 0x2e1   :  { %v295_v42 = vsel %vm253_vm5, %v293_v36, 0.0 }
 0x34e   :  { %v268_v27 = vpop.xlane.xlu0 %267 }
 0x34f   :  { %v381_v28 = vtrunc.f32 %v268_v27 }
 0x351   :  { %v382_v30 = vcvt.f32.s32 %v381_v28 }
 0x352   :  { %v271_v34 = vpop.xlane.xlu1 %270 }
 0x353   :  { %vm296_vm11 = vcmp.eq.s32.totalorder %v493_v51, %v382_v30  ;;  %v308_v35 = vsel %vm307_vm9, %v382_v30, %v305_v31  ;;  %v383_v37 = vtrunc.f32 %v271_v34 }
 0x354   :  { %v300_v38 = vsel %vm296_vm11, %v298_v33, %v294_v32  ;;  %311 = vst.msk [vmem:[%s552_s7] sm:$0xff] %vm310_vm10, %v308_v35 }
 0x355   :  { %302 = vst.msk [vmem:[%s553_s6] sm:$0xff] %vm233_vm1, %v300_v38  ;;  %v384_v39 = vcvt.f32.s32 %v383_v37 }
 0x357   :  { %vm297_vm12 = vcmp.eq.s32.totalorder %v493_v51, %v384_v39  ;;  %v309_v43 = vsel %vm307_vm9, %v384_v39, %v306_v40 }
 0x358   :  { %v301_v44 = vsel %vm297_vm12, %v299_v41, %v295_v42  ;;  %312 = vst.msk [vmem:[%s552_s7 + $0x8] sm:$0xff] %vm310_vm10, %v309_v43 }
 0x359   :  { %303 = vst.msk [vmem:[%s553_s6 + $0x8] sm:$0xff] %vm233_vm1, %v301_v44 }

</bundles_post_ra>
